<compile_context>
chip_gen: v7x
topology: tpu7x:2x2x1
jax: 0.10.0
libtpu: 0.0.40
codegen_flags: <defaults>
</compile_context>

<pallas_src>
import math
import jax
import jax.numpy as jnp
from jax.experimental import pallas as pl
from jax.experimental.pallas import tpu as pltpu


def _action_net_kernel(x_ref, w1_ref, b1_ref, w2_ref, b2_ref, o_ref):
    # Fused MLP: (tm, A) @ (A, H) + b1 -> ReLU -> @ (H, D) + b2
    # Matmul inputs in the bf16 weight dtype (native MXU path); accumulate,
    # bias-add and ReLU in f32; final store in o_ref.dtype (bf16 by default).
    x = x_ref[...].astype(w1_ref.dtype)            # no-op if producer emits bf16
    h = jnp.dot(x, w1_ref[...], preferred_element_type=jnp.float32)
    h = jnp.maximum(h + b1_ref[...], 0.0)          # bias + ReLU in f32
    y = jnp.dot(h.astype(w2_ref.dtype), w2_ref[...],
                preferred_element_type=jnp.float32)
    o_ref[...] = (y + b2_ref[...]).astype(o_ref.dtype)


def _pick_batch_tile(B: int, tm_max: int = 1024):
    """Pick (tm, grid_steps) for the batch axis.

    Overhead-bound kernel -> biggest tile that fits, BUT keep an even number of
    >=2 grid steps when the batch is large enough so the "parallel" axis shards
    across both v7x TensorCores.  Single-TC chips just see a short serial loop.
    """
    if B < 16:
        return B, 1                           # one full-extent block (always legal)
    if B <= 2 * tm_max:
        n = 2                                 # two balanced steps for the megacore
    else:
        n = pl.cdiv(B, tm_max)
        n += n % 2                            # even step count -> balanced 2-TC split
    tm = ((pl.cdiv(B, n) + 7) // 8) * 8       # multiple of 8 (sublane granularity)
    return tm, pl.cdiv(B, tm)


def action_net_forward(x, w1, b1, w2, b2, *, out_dtype=jnp.bfloat16, tm_max=1024):
    """x: (B, A); w1: (A, 512) bf16; b1: (1, 512) f32; w2: (512, D) bf16; b2: (1, D) f32.

    Returns (B, D) in out_dtype (bf16 default; use jnp.float32 for torch-exact dtype).
    """
    B, A = x.shape
    H = w1.shape[1]
    D = w2.shape[1]

    tm, steps = _pick_batch_tile(B, tm_max)

    flops = 2 * B * (A * H + H * D)
    bytes_accessed = (
        x.size * x.dtype.itemsize
        + w1.size * w1.dtype.itemsize + b1.size * b1.dtype.itemsize
        + w2.size * w2.dtype.itemsize + b2.size * b2.dtype.itemsize
        + B * D * jnp.dtype(out_dtype).itemsize
    )

    return pl.pallas_call(
        _action_net_kernel,
        out_shape=jax.ShapeDtypeStruct((B, D), out_dtype),
        grid=(steps,),
        in_specs=[
            pl.BlockSpec((tm, A), lambda i: (i, 0)),   # x tile follows the batch axis
            pl.BlockSpec((A, H), lambda i: (0, 0)),    # weights/biases stay VMEM-resident
            pl.BlockSpec((1, H), lambda i: (0, 0)),
            pl.BlockSpec((H, D), lambda i: (0, 0)),    # D kept unpadded (masked stores
            pl.BlockSpec((1, D), lambda i: (0, 0)),    #  beat 2x write-back traffic)
        ],
        out_specs=pl.BlockSpec((tm, D), lambda i: (i, 0)),
        compiler_params=pltpu.CompilerParams(
            dimension_semantics=("parallel",),         # shard batch over both TCs (v7x)
            vmem_limit_bytes=32 * 1024 * 1024,         # headroom past v5e's 16 MiB default
        ),
        cost_estimate=pl.CostEstimate(
            flops=flops, transcendentals=0, bytes_accessed=bytes_accessed),
    )(x, w1, b1, w2, b2)


def init_linear_params(key, in_features, out_features,
                       weight_dtype=jnp.bfloat16, bias_dtype=jnp.float32):
    """torch.nn.Linear-style init (kaiming-uniform W, uniform bias, bound 1/sqrt(fan_in)).
    Weights stored (in_features, out_features) in bf16; biases (1, out) in f32."""
    kw, kb = jax.random.split(key)
    bound = 1.0 / math.sqrt(in_features)
    w = jax.random.uniform(kw, (in_features, out_features),
                           minval=-bound, maxval=bound,
                           dtype=jnp.float32).astype(weight_dtype)
    b = jax.random.uniform(kb, (1, out_features),
                           minval=-bound, maxval=bound, dtype=bias_dtype)
    return w, b


def _reference(x, w1, b1, w2, b2, out_dtype):
    # Same math / same casts in plain JAX (bf16 matmul inputs, f32 accumulation).
    h = jnp.dot(x.astype(w1.dtype), w1, preferred_element_type=jnp.float32) + b1
    h = jnp.maximum(h, 0.0)
    y = jnp.dot(h.astype(w2.dtype), w2, preferred_element_type=jnp.float32) + b2
    return y.astype(out_dtype)


if __name__ == "__main__":
    # Small shapes consistent with the module:
    #   args.action_num = 16, hidden = 512 (fixed in the module), args.op_img_dim = 64
    action_num = 16
    hidden = 512
    op_img_dim = 64

    key = jax.random.PRNGKey(0)
    k1, k2, kx0, kx1, kx2 = jax.random.split(key, 5)

    w1, b1 = init_linear_params(k1, action_num, hidden)
    w2, b2 = init_linear_params(k2, hidden, op_img_dim)

    ok = True
    cases = (
        (kx0, 8, jnp.bfloat16),    # tiny batch: single full-extent block
        (kx1, 37, jnp.bfloat16),   # ragged batch: 2 grid steps, masked last block
        (kx2, 96, jnp.float32),    # even 2-step split + f32 output path
    )
    for kxi, batch, odt in cases:
        x = jax.random.normal(kxi, (batch, action_num), dtype=jnp.float32)
        out = action_net_forward(x, w1, b1, w2, b2, out_dtype=odt)
        out = jax.block_until_ready(out)
        ref = _reference(x, w1, b1, w2, b2, odt)
        ok &= out.shape == (batch, op_img_dim)
        ok &= out.dtype == jnp.dtype(odt)
        ok &= bool(jnp.allclose(out.astype(jnp.float32), ref.astype(jnp.float32),
                                atol=2e-2, rtol=2e-2))

    assert ok
    print("KERNEL_OK")
</pallas_src>

<mosaic_0001>
module attributes {stable_mosaic.version = 11 : i64} {
  func.func @_action_net_kernel(%arg0: i32, %arg1: memref<8x16xf32, #tpu.memory_space<vmem>>, %arg2: memref<16x512xbf16, #tpu.memory_space<vmem>>, %arg3: memref<1x512xf32, #tpu.memory_space<vmem>>, %arg4: memref<512x64xbf16, #tpu.memory_space<vmem>>, %arg5: memref<1x64xf32, #tpu.memory_space<vmem>>, %arg6: memref<8x64xbf16, #tpu.memory_space<vmem>>) attributes {dimension_semantics = [#tpu.dimension_semantics<parallel>], iteration_bounds = array<i64: 1>, scalar_prefetch = 0 : i64, scratch_operands = 0 : i64, tpu.core_type = #tpu.core_type<tc>, window_params = [{transform_indices = @transform_0, window_bounds = array<i64: 8, 16>}, {pipeline_mode = #tpu.pipeline_mode<synchronous>, transform_indices = @transform_1, window_bounds = array<i64: 16, 512>}, {pipeline_mode = #tpu.pipeline_mode<synchronous>, transform_indices = @transform_2, window_bounds = array<i64: 1, 512>}, {pipeline_mode = #tpu.pipeline_mode<synchronous>, transform_indices = @transform_3, window_bounds = array<i64: 512, 64>}, {pipeline_mode = #tpu.pipeline_mode<synchronous>, transform_indices = @transform_4, window_bounds = array<i64: 1, 64>}, {transform_indices = @transform_5, window_bounds = array<i64: 8, 64>}]} {
    %c0 = arith.constant 0 : index
    %c0_0 = arith.constant 0 : index
    %0 = vector.load %arg1[%c0, %c0_0] : memref<8x16xf32, #tpu.memory_space<vmem>>, vector<8x16xf32>
    %1 = arith.truncf %0 : vector<8x16xf32> to vector<8x16xbf16>
    %c0_1 = arith.constant 0 : index
    %c0_2 = arith.constant 0 : index
    %2 = vector.load %arg2[%c0_1, %c0_2] : memref<16x512xbf16, #tpu.memory_space<vmem>>, vector<16x512xbf16>
    %cst = arith.constant dense<0.000000e+00> : vector<8x512xf32>
    %3 = tpu.matmul %1, %2, %cst {dimension_numbers = #tpu.dot_dimension_numbers<[1], [0], [0], [1], [0, 0, 1, 1], [], []>} : vector<8x16xbf16>, vector<16x512xbf16>, vector<8x512xf32> -> vector<8x512xf32>
    %c0_3 = arith.constant 0 : index
    %c0_4 = arith.constant 0 : index
    %4 = vector.load %arg3[%c0_3, %c0_4] : memref<1x512xf32, #tpu.memory_space<vmem>>, vector<1x512xf32>
    %5 = vector.broadcast %4 : vector<1x512xf32> to vector<8x512xf32>
    %6 = arith.addf %3, %5 : vector<8x512xf32>
    %cst_5 = arith.constant 0.000000e+00 : f32
    %7 = vector.broadcast %cst_5 : f32 to vector<8x512xf32>
    %8 = arith.maximumf %6, %7 : vector<8x512xf32>
    %9 = arith.truncf %8 : vector<8x512xf32> to vector<8x512xbf16>
    %c0_6 = arith.constant 0 : index
    %c0_7 = arith.constant 0 : index
    %10 = vector.load %arg4[%c0_6, %c0_7] : memref<512x64xbf16, #tpu.memory_space<vmem>>, vector<512x64xbf16>
    %cst_8 = arith.constant dense<0.000000e+00> : vector<8x64xf32>
    %11 = tpu.matmul %9, %10, %cst_8 {dimension_numbers = #tpu.dot_dimension_numbers<[1], [0], [0], [1], [0, 0, 1, 1], [], []>} : vector<8x512xbf16>, vector<512x64xbf16>, vector<8x64xf32> -> vector<8x64xf32>
    %c0_9 = arith.constant 0 : index
    %c0_10 = arith.constant 0 : index
    %12 = vector.load %arg5[%c0_9, %c0_10] : memref<1x64xf32, #tpu.memory_space<vmem>>, vector<1x64xf32>
    %13 = vector.broadcast %12 : vector<1x64xf32> to vector<8x64xf32>
    %14 = arith.addf %11, %13 : vector<8x64xf32>
    %15 = arith.truncf %14 : vector<8x64xf32> to vector<8x64xbf16>
    %c0_11 = arith.constant 0 : index
    %c0_12 = arith.constant 0 : index
    %16 = vector.load %arg6[%c0_11, %c0_12] : memref<8x64xbf16, #tpu.memory_space<vmem>>, vector<8x64xbf16>
    tpu.vector_store %arg6[%c0_11, %c0_12], %15 {strides = array<i32>} : memref<8x64xbf16, #tpu.memory_space<vmem>>, vector<8x64xbf16>,
    return
  }
  func.func @transform_0(%arg0: i32) -> (i32, i32) {
    %c0_i32 = arith.constant 0 : i32
    %c0_i32_0 = arith.constant 0 : i32
    return %arg0, %c0_i32 : i32, i32
  }
  func.func @transform_1(%arg0: i32) -> (i32, i32) {
    %c0_i32 = arith.constant 0 : i32
    %c0_i32_0 = arith.constant 0 : i32
    %c0_i32_1 = arith.constant 0 : i32
    return %c0_i32, %c0_i32_0 : i32, i32
  }
  func.func @transform_2(%arg0: i32) -> (i32, i32) {
    %c0_i32 = arith.constant 0 : i32
    %c0_i32_0 = arith.constant 0 : i32
    %c0_i32_1 = arith.constant 0 : i32
    return %c0_i32, %c0_i32_0 : i32, i32
  }
  func.func @transform_3(%arg0: i32) -> (i32, i32) {
    %c0_i32 = arith.constant 0 : i32
    %c0_i32_0 = arith.constant 0 : i32
    %c0_i32_1 = arith.constant 0 : i32
    return %c0_i32, %c0_i32_0 : i32, i32
  }
  func.func @transform_4(%arg0: i32) -> (i32, i32) {
    %c0_i32 = arith.constant 0 : i32
    %c0_i32_0 = arith.constant 0 : i32
    %c0_i32_1 = arith.constant 0 : i32
    return %c0_i32, %c0_i32_0 : i32, i32
  }
  func.func @transform_5(%arg0: i32) -> (i32, i32) {
    %c0_i32 = arith.constant 0 : i32
    %c0_i32_0 = arith.constant 0 : i32
    return %arg0, %c0_i32 : i32, i32
  }
}

</mosaic_0001>

<bundles_post_ra>
// kernel: tpu_custom_call.1
= control target key start
LH: loop header
LB: loop body
LE: loop exit
PB: predicated region body
PF: predicated region fallthrough
CT: control target
= control target key end

     0   :  { %v671_v2 = vmov 0   ;;  %vm70_vm0 = vcmask 130048   ;;  %s832_s0 = inlined_call_operand.vmem [shape: f32[8,16], index: 0, kind: input, shape index: {}]   ;;  %s833_s1 = inlined_call_operand.vmem [shape: bf16[16,512], index: 1, kind: input, shape index: {}]   ;;  %s834_s2 = inlined_call_operand.vmem [shape: f32[1,512], index: 2, kind: input, shape index: {}]   ;;  %s835_s3 = inlined_call_operand.vmem [shape: bf16[512,64], index: 3, kind: input, shape index: {}]   ;;  %s836_s4 = inlined_call_operand.vmem [shape: f32[1,64], index: 4, kind: input, shape index: {}]   ;;  %s837_s5 = inlined_call_operand.hbm [shape: bf16[8,64], index: 5, kind: output, shape index: {}]  }
   0x1   :  { %v609_v0 = vld [vmem:[%s833_s1 + $0x4] ss:$16 sps:$4 sm:$0xff]   ;;  %v611_v1 = vld [vmem:[%s833_s1 + $0xc] ss:$16 sps:$4 sm:$0xff]   ;;  %106 = vmatprep.mubr.bf16.mxu0 %v671_v2  ;;  %147 = vmatprep.mubr.bf16.mxu1 %v671_v2  ;;  %v613_v3 = vld [vmem:[%s833_s1] ss:$16 sps:$4 sm:$0xff]  }
   0x2   :  { %74 = vmatprep.subr.bf16.mxu0 %v609_v0  ;;  %v614_v4 = vld [vmem:[%s833_s1 + $0x8] ss:$16 sps:$4 sm:$0xff]   ;;  %v22_v5 = vld [vmem:[%s832_s0] sm:$0xff]  ;;  %115 = vmatprep.subr.bf16.mxu1 %v611_v1  ;;  %v623_v15 = vld [vmem:[%s835_s3 + $0x50] sm:$0xff]  }
   0x3   :  { %v23_v6 = vpack.c.bf16 %v22_v5, %v22_v5  ;;  %v615_v7 = vld [vmem:[%s835_s3 + $0x40] sm:$0xff]   ;;  %75 = vmatpush1.bf16.msra.mxu0 %v613_v3  ;;  %116 = vmatpush1.bf16.msra.mxu1 %v614_v4  ;;  %v619_v11 = vld [vmem:[%s835_s3 + $0x48] sm:$0xff]   ;;  %v624_v16 = vld [vmem:[%s835_s3 + $0xd0] sm:$0xff]  }
   0x4   :  { %v616_v8 = vld [vmem:[%s835_s3 + $0xc0] sm:$0xff]   ;;  %563 = vmatprep.subr.bf16.mxu0 %v615_v7  ;;  %v620_v12 = vld [vmem:[%s835_s3 + $0xc8] sm:$0xff]   ;;  %v625_v17 = vld [vmem:[%s835_s3 + $0x10] sm:$0xff]  }
   0x5   :  { %v617_v9 = vld [vmem:[%s835_s3] sm:$0xff]   ;;  %585 = vmatprep.subr.bf16.mxu1 %v616_v8  ;;  %v621_v13 = vld [vmem:[%s835_s3 + $0x8] sm:$0xff]   ;;  %v626_v18 = vld [vmem:[%s835_s3 + $0x90] sm:$0xff]  }
   0x6   :  { %v618_v10 = vld [vmem:[%s835_s3 + $0x80] sm:$0xff]   ;;  %528 = vmatmul.mubr.msk.bf16.vlgmr.msra.gmra.mrb[0].mxu0 %vm70_vm0, %v23_v6  ;;  %529 = vmatmul.mubr.msk.bf16.vlgmr.msra.gmra.mrb[0].mxu1 %vm70_vm0, %v23_v6  ;;  %v622_v14 = vld [vmem:[%s835_s3 + $0x88] sm:$0xff]   ;;  %v627_v19 = vld [vmem:[%s835_s3 + $0x58] sm:$0xff]  }
   0x7   :  { %564 = vmatpush3.bf16.msra.mxu0 %v617_v9  ;;  %586 = vmatpush3.bf16.msra.mxu1 %v618_v10  ;;  %v628_v20 = vld [vmem:[%s835_s3 + $0xd8] sm:$0xff]   ;;  %v631_v23 = vld [vmem:[%s835_s3 + $0x60] sm:$0xff]   ;;  %v635_v27 = vld [vmem:[%s835_s3 + $0x68] sm:$0xff]  }
   0x8   :  { %565 = vmatprep.subr.bf16.mxu0 %v619_v11  ;;  %587 = vmatprep.subr.bf16.mxu1 %v620_v12  ;;  %v629_v21 = vld [vmem:[%s835_s3 + $0x18] sm:$0xff]   ;;  %v632_v24 = vld [vmem:[%s835_s3 + $0xe0] sm:$0xff]   ;;  %v636_v28 = vld [vmem:[%s835_s3 + $0xe8] sm:$0xff]  }
   0x9   :  { %v630_v22 = vld [vmem:[%s835_s3 + $0x98] sm:$0xff]   ;;  %v633_v25 = vld [vmem:[%s835_s3 + $0x20] sm:$0xff]   ;;  %v637_v29 = vld [vmem:[%s835_s3 + $0x28] sm:$0xff]  }
   0xa   :  { %v634_v26 = vld [vmem:[%s835_s3 + $0xa0] sm:$0xff]   ;;  %v638_v30 = vld [vmem:[%s835_s3 + $0xa8] sm:$0xff]  }
   0xb   :  { %566 = vmatpush3.bf16.msra.mxu0 %v621_v13  ;;  %588 = vmatpush3.bf16.msra.mxu1 %v622_v14 }
   0xc   :  { %567 = vmatprep.subr.bf16.mxu0 %v623_v15  ;;  %589 = vmatprep.subr.bf16.mxu1 %v624_v16 }
   0xf   :  { %568 = vmatpush3.bf16.msra.mxu0 %v625_v17  ;;  %590 = vmatpush3.bf16.msra.mxu1 %v626_v18 }
  0x10   :  { %569 = vmatprep.subr.bf16.mxu0 %v627_v19  ;;  %591 = vmatprep.subr.bf16.mxu1 %v628_v20 }
  0x13   :  { %570 = vmatpush3.bf16.msra.mxu0 %v629_v21  ;;  %592 = vmatpush3.bf16.msra.mxu1 %v630_v22 }
  0x14   :  { %571 = vmatprep.subr.bf16.mxu0 %v631_v23  ;;  %593 = vmatprep.subr.bf16.mxu1 %v632_v24 }
  0x17   :  { %572 = vmatpush3.bf16.msra.mxu0 %v633_v25  ;;  %594 = vmatpush3.bf16.msra.mxu1 %v634_v26 }
  0x18   :  { %573 = vmatprep.subr.bf16.mxu0 %v635_v27  ;;  %595 = vmatprep.subr.bf16.mxu1 %v636_v28 }
  0x1b   :  { %574 = vmatpush3.bf16.msra.mxu0 %v637_v29  ;;  %596 = vmatpush3.bf16.msra.mxu1 %v638_v30 }
  0x1c   :  { %10 = vsyncpa [#allocation3], 0  ;;  %v639_v31 = vld [vmem:[%s835_s3 + $0x70] sm:$0xff]   ;;  %v643_v35 = vld [vmem:[%s835_s3 + $0x78] sm:$0xff]   ;;  %v30_v39 = vlaneseq  ;;  %s672_s13 = smov [#allocation2]   ;;  %vm508_vm1 = vcmask 519168  }
  0x1d   :  { %v640_v32 = vld [vmem:[%s835_s3 + $0xf0] sm:$0xff]   ;;  %575 = vmatprep.subr.bf16.mxu0 %v639_v31  ;;  %v644_v36 = vld [vmem:[%s835_s3 + $0xf8] sm:$0xff]   ;;  %v28_v43 = vld [vmem:[%s834_s2] sm:$0xf]  ;;  %s516_s14 = sshll.u32 %s672_s13, 4  ;;  %s517_s14 = int_to_ptr.vmem [resolvable:$true] %s516_s14 }
  0x1e   :  { %v641_v33 = vld [vmem:[%s835_s3 + $0x30] sm:$0xff]   ;;  %597 = vmatprep.subr.bf16.mxu1 %v640_v32  ;;  %v645_v37 = vld [vmem:[%s835_s3 + $0x38] sm:$0xff]   ;;  %v31_v40 = vshrl.u32 %v30_v39, 7  ;;  %v530_v8 = vld [vmem:[%s836_s4] ss:$0 sm:$0xff]  ;;  %s647_s15 = scalar_lea.vmem %s517_s14, 64  ;;  %p652_p1 = scmp.lt.s32.totalorder %s517_s14, %s517_s14 }
  0x1f   :  { %v642_v34 = vld [vmem:[%s835_s3 + $0xb0] sm:$0xff]   ;;  %576 = vmatpush3.bf16.msra.mxu0 %v641_v33  ;;  %v646_v38 = vld [vmem:[%s835_s3 + $0xb8] sm:$0xff]   ;;  %p648_p0 = scmp.ne.s32.totalorder %s517_s14, %s647_s15  ;;  %p653_p2 = scmp.lt.s32.totalorder %s647_s15, %s647_s15 }
  0x20   :  { %598 = vmatpush3.bf16.msra.mxu1 %v642_v34  ;;  %577 = vmatprep.subr.bf16.mxu0 %v643_v35  ;;  %v32_v41 = vsub.s32 0, %v31_v40  ;;  %v40_v42 = vsub.s32 2, %v31_v40  ;;  %v36_v44 = vsub.s32 1, %v31_v40  ;;  %v44_v45 = vsub.s32 3, %v31_v40 }
  0x21   :  { %599 = vmatprep.subr.bf16.mxu1 %v644_v36  ;;  %p654_p3 = por %p653_p2, %p652_p1 }
  0x22   :  { %v33_v46 = vrot.slane %v28_v43, %v32_v41  ;;  %v41_v47 = vrot.slane %v28_v43, %v40_v42  ;;  %v37_v48 = vrot.slane %v28_v43, %v36_v44  ;;  %v45_v49 = vrot.slane %v28_v43, %v44_v45 }
  0x23   :  { %578 = vmatpush3.bf16.msra.mxu0 %v645_v37  ;;  %p655_p4 = pnand %p654_p3, %p648_p0 }
  0x24   :  { %600 = vmatpush3.bf16.msra.mxu1 %v646_v38 }
  0xd9   :  { %v108_v50 = vpop.f32.mrb[0].mxu0  ;;  %v149_v51 = vpop.f32.mrb[0].mxu1 }
  0xda   :  { %v109_v52 = vadd.f32 %v108_v50, %v33_v46  ;;  %v150_v53 = vadd.f32 %v149_v51, %v41_v47  ;;  %v110_v54 = vpop.f32.mrb[1].mxu0  ;;  %v151_v55 = vpop.f32.mrb[1].mxu1 }
  0xdb   :  { %v111_v56 = vadd.f32 %v110_v54, %v37_v48  ;;  %v152_v57 = vadd.f32 %v151_v55, %v45_v49  ;;  %v112_v58 = vpop.f32.mrb[2].mxu0  ;;  %v153_v59 = vpop.f32.mrb[2].mxu1 }
  0xdc   :  { %v156_v60 = vmax.f32 %v109_v52, 0.0  ;;  %v158_v61 = vmax.f32 %v150_v53, 0.0  ;;  %v113_v62 = vpop.f32.mrb[3].mxu0  ;;  %v154_v63 = vpop.f32.mrb[3].mxu1 }
  0xdd   :  { %v157_v0 = vmax.f32 %v111_v56, 0.0  ;;  %v159_v1 = vmax.f32 %v152_v57, 0.0 }
  0xde   :  { %v162_v2 = vpack.c.bf16 %v158_v61, %v158_v61  ;;  %v160_v5 = vpack.c.bf16 %v156_v60, %v156_v60 }
  0xdf   :  { %v161_v3 = vpack.c.bf16 %v157_v0, %v157_v0  ;;  %v163_v4 = vpack.c.bf16 %v159_v1, %v159_v1 }
  0xe1   :  { %459 = vmatprep.mubr.bf16.mxu0 %v161_v3  ;;  %499 = vmatprep.mubr.bf16.mxu1 %v163_v4 }
  0xe2   :  { %460 = vmatmul.mubr.bf16.vlgmr.msra.gmra.mrb[4].mxu0 %v160_v5  ;;  %500 = vmatmul.mubr.bf16.vlgmr.msra.gmra.mrb[4].mxu1 %v162_v2 }
 0x1b5   :  { %v579_v6 = vpop.f32.mrb[4].mxu0  ;;  %v601_v7 = vpop.f32.mrb[4].mxu1 }
 0x1b6   :  { %v580_v9 = vpop.f32.mrb[5].mxu0  ;;  %v602_v10 = vpop.f32.mrb[5].mxu1 }
 0x1b7   :  { %v581_v11 = vadd.f32 %v580_v9, %v579_v6  ;;  %v603_v12 = vadd.f32 %v602_v10, %v601_v7  ;;  %v582_v13 = vpop.f32.mrb[6].mxu0  ;;  %v604_v14 = vpop.f32.mrb[6].mxu1 }
 0x1b8   :  { %v583_v15 = vpop.f32.mrb[7].mxu0  ;;  %v605_v16 = vpop.f32.mrb[7].mxu1 }
 0x1b9   :  { %v462_v17 = vadd.f32 %v581_v11, %v530_v8 }
 0x1bb   :  { %v502_v18 = vadd.f32 %v603_v12, %v462_v17 }
 0x1bd   :  { %v507_v19 = vpack.c.bf16 %v502_v18, %v502_v18 }
 0x1bf   :  { %509 = vst.msk [vmem:[#allocation2] sm:$0xf] %vm508_vm1, %v507_v19 }
 0x1c0   :  { %658 = shalt.err (!%p655_p4)
}
 0x1c1   :  { %s659_s17 = scalar_lea.hbm %s837_s5, 64 }
 0x1c2   :  { %p660_p5 = scmp.ne.s32.totalorder %s837_s5, %s659_s17  ;;  %p663_p6 = scmp.lt.u32.totalorder %s659_s17, %s837_s5 }
 0x1c4   :  { %p665_p7 = pnand %p663_p6, %p660_p5 }
 0x1c6   :  { %668 = shalt.err (!%p665_p7)
}
 0x1c7   :  { %519 = dma.vmem_to_hbm [thread:$0]  %s517_s14, 64, %s837_s5, [#allocation3]  }
 0x1c8   :  { %669 = dma.done.wait [#allocation3], 64  }
 0x1c9   :  { %670 = vsyncadd [#allocation3], 4294967232 }
 0x1ca   :  { %523 = vsyncpa [#allocation3], 1 }

</bundles_post_ra>
